<compile_context>
chip_gen: v5e
topology: v5e:2x2
jax: 0.10.0
libtpu: 0.0.40
codegen_flags: <defaults>
</compile_context>

<pallas_src>
import functools

import jax
import jax.numpy as jnp
from jax.experimental import pallas as pl
from jax.experimental.pallas import tpu as pltpu


def _iln_kernel(x_ref, rho_ref, gamma_ref, o_ref, *, eps):
    # x_ref: (TB, C, HW);  rho_ref / gamma_ref: (1, C, 1)
    x = x_ref[...].astype(jnp.float32)
    _, c, hw = x.shape

    # ---- single pass over the block: per-channel sum and sum of squares ----
    ch_sum = jnp.sum(x, axis=2, keepdims=True)        # (TB, C, 1)  lane reduce
    ch_sumsq = jnp.sum(x * x, axis=2, keepdims=True)  # (TB, C, 1)  lane reduce

    # ---- instance-norm stats per (b, c): unbiased variance (N-1) ----
    # NOTE: hw == 1 would divide by zero, same failure mode as torch.var.
    in_mean = ch_sum * (1.0 / hw)                                   # (TB, C, 1)
    in_var = (ch_sumsq - hw * in_mean * in_mean) * (1.0 / (hw - 1))

    # ---- layer-norm stats per b: aggregate the C per-channel sums ----
    n = c * hw
    ln_mean = jnp.sum(ch_sum, axis=1, keepdims=True) * (1.0 / n)    # (TB, 1, 1)
    ln_sumsq = jnp.sum(ch_sumsq, axis=1, keepdims=True)             # (TB, 1, 1)
    ln_var = (ln_sumsq - n * ln_mean * ln_mean) * (1.0 / (n - 1))

    inv_in = jax.lax.rsqrt(in_var + eps)   # (TB, C, 1)  EUP
    inv_ln = jax.lax.rsqrt(ln_var + eps)   # (TB, 1, 1)  EUP

    rho = rho_ref[...].astype(jnp.float32)      # (1, C, 1)
    gamma = gamma_ref[...].astype(jnp.float32)  # (1, C, 1)

    # ---- fold norm + affine into per-channel scale/shift: out = x*s + t ----
    one_minus_rho = 1.0 - rho
    mix_scale = rho * inv_in + one_minus_rho * inv_ln                      # (TB, C, 1)
    mix_shift = rho * (in_mean * inv_in) + one_minus_rho * (ln_mean * inv_ln)
    s = gamma * mix_scale
    t = gamma - gamma * mix_shift   # bias == gamma (reference forward() quirk)

    o_ref[...] = (x * s + t).astype(o_ref.dtype)


def _choose_tb(B, C, HW, itemsize):
    """Images per grid step.

    Big enough to amortize the ~0.35 us per-step pipeline overhead, small
    enough that the full working set (double-buffered in/out blocks plus the
    in-kernel f32 temporaries) stays well under every chip's VMEM, and (when
    possible) leaving >= 2 grid steps so both TensorCores get work.
    """
    img_bytes = C * HW * itemsize            # one image on the wire
    img_f32 = C * HW * 4                     # one image as f32 inside the kernel
    # 2x in (dbuf) + 2x out (dbuf) + ~3 f32 temporaries (cast, x*x, result).
    per_img_working_set = 4 * img_bytes + 3 * img_f32
    vmem_budget = 32 * 1024 * 1024
    max_tb_vmem = max(1, vmem_budget // per_img_working_set)
    target_tb = max(1, (2 << 20) // max(1, img_bytes))   # ~2 MiB input blocks
    tb = int(min(B, max_tb_vmem, target_tb))
    if B >= 2:                                           # prefer >= 2 grid steps
        tb = max(1, min(tb, B // 2))
    while B % tb != 0:                                   # blocks must tile B
        tb -= 1
    return tb


def iln_forward(x, rho, gamma, eps=1e-5):
    """x: (B, C, H, W) NCHW.  rho/gamma: (1, C, 1, 1).  Returns (B, C, H, W)."""
    B, C, H, W = x.shape
    HW = H * W
    x_flat = x.reshape(B, C, HW)
    rho_3d = rho.reshape(1, C, 1)
    gamma_3d = gamma.reshape(1, C, 1)

    TB = _choose_tb(B, C, HW, jnp.dtype(x.dtype).itemsize)
    grid = (B // TB,)

    kernel = functools.partial(_iln_kernel, eps=eps)

    out_flat = pl.pallas_call(
        kernel,
        out_shape=jax.ShapeDtypeStruct((B, C, HW), x.dtype),
        grid_spec=pltpu.PrefetchScalarGridSpec(
            num_scalar_prefetch=0,
            grid=grid,
            in_specs=[
                pl.BlockSpec((TB, C, HW), lambda b: (b, 0, 0)),
                pl.BlockSpec((1, C, 1), lambda b: (0, 0, 0)),
                pl.BlockSpec((1, C, 1), lambda b: (0, 0, 0)),
            ],
            out_specs=pl.BlockSpec((TB, C, HW), lambda b: (b, 0, 0)),
        ),
        compiler_params=pltpu.CompilerParams(
            dimension_semantics=("parallel",),
            # Budgeted by _choose_tb to stay well under this; 48 MiB is safe
            # on v5e/v6e (128 MiB physical) and v7x (64 MiB physical).
            vmem_limit_bytes=48 * 1024 * 1024,
        ),
    )(x_flat, rho_3d, gamma_3d)

    return out_flat.reshape(B, C, H, W)


def iln_reference(x, rho, gamma, eps=1e-5):
    """Pure-JAX reference mirroring the PyTorch forward (unbiased var, bias=gamma)."""
    B, C, H, W = x.shape
    xf = x.reshape(B, C, -1)
    in_mean = jnp.mean(xf, axis=2)[:, :, None, None]
    in_var = jnp.var(xf, axis=2, ddof=1)[:, :, None, None]
    a_in = (x - in_mean) / jnp.sqrt(in_var + eps)
    xl = x.reshape(B, -1)
    ln_mean = jnp.mean(xl, axis=1)[:, None, None, None]
    ln_var = jnp.var(xl, axis=1, ddof=1)[:, None, None, None]
    a_ln = (x - ln_mean) / jnp.sqrt(ln_var + eps)
    return gamma * (rho * a_in + (1.0 - rho) * a_ln) + gamma


if __name__ == "__main__":
    B, C, H, W = 2, 4, 16, 16
    eps = 1e-5

    key = jax.random.PRNGKey(0)
    x = jax.random.normal(key, (B, C, H, W), dtype=jnp.float32)

    # Parameter init matching the nn.Parameter fills in __init__
    rho = jnp.full((1, C, 1, 1), 0.0, dtype=jnp.float32)
    gamma = jnp.full((1, C, 1, 1), 1.0, dtype=jnp.float32)
    beta = jnp.full((1, C, 1, 1), 0.0, dtype=jnp.float32)  # unused in forward (matches reference)

    out = iln_forward(x, rho, gamma, eps)
    out = jax.block_until_ready(out)

    ref = iln_reference(x, rho, gamma, eps)
    assert out.shape == (B, C, H, W)
    assert jnp.allclose(out, ref, atol=1e-4, rtol=1e-4), "mismatch vs reference"

    # also exercise a multi-image-per-block + non-trivial-param path
    x2 = jax.random.normal(jax.random.PRNGKey(1), (8, C, H, W), dtype=jnp.float32)
    rho2 = jax.random.uniform(jax.random.PRNGKey(2), (1, C, 1, 1), dtype=jnp.float32)
    gamma2 = jax.random.normal(jax.random.PRNGKey(3), (1, C, 1, 1), dtype=jnp.float32)
    out2 = jax.block_until_ready(iln_forward(x2, rho2, gamma2, eps))
    ref2 = iln_reference(x2, rho2, gamma2, eps)
    assert jnp.allclose(out2, ref2, atol=1e-4, rtol=1e-4), "mismatch vs reference (batched)"

    # and a bf16 path (I/O stays bf16, stats in f32)
    x3 = jax.random.normal(jax.random.PRNGKey(4), (4, C, H, W), dtype=jnp.bfloat16)
    out3 = jax.block_until_ready(iln_forward(x3, rho2, gamma2, eps))
    ref3 = iln_reference(x3.astype(jnp.float32), rho2, gamma2, eps)
    assert out3.dtype == jnp.bfloat16
    assert jnp.allclose(out3.astype(jnp.float32), ref3, atol=5e-2, rtol=5e-2), \
        "mismatch vs reference (bf16)"

    print("KERNEL_OK")
</pallas_src>

<mosaic_0001>
module attributes {stable_mosaic.version = 11 : i64} {
  func.func @_iln_kernel(%arg0: i32, %arg1: memref<1x4x256xf32, #tpu.memory_space<vmem>>, %arg2: memref<1x4x1xf32, #tpu.memory_space<vmem>>, %arg3: memref<1x4x1xf32, #tpu.memory_space<vmem>>, %arg4: memref<1x4x256xf32, #tpu.memory_space<vmem>>) attributes {dimension_semantics = [#tpu.dimension_semantics<parallel>], iteration_bounds = array<i64: 2>, scalar_prefetch = 0 : i64, scratch_operands = 0 : i64, tpu.core_type = #tpu.core_type<tc>, window_params = [{transform_indices = @transform_0, window_bounds = array<i64: 1, 4, 256>}, {pipeline_mode = #tpu.pipeline_mode<synchronous>, transform_indices = @transform_1, window_bounds = array<i64: 1, 4, 1>}, {pipeline_mode = #tpu.pipeline_mode<synchronous>, transform_indices = @transform_2, window_bounds = array<i64: 1, 4, 1>}, {transform_indices = @transform_3, window_bounds = array<i64: 1, 4, 256>}]} {
    %c0 = arith.constant 0 : index
    %c0_0 = arith.constant 0 : index
    %c0_1 = arith.constant 0 : index
    %0 = vector.load %arg1[%c0, %c0_0, %c0_1] : memref<1x4x256xf32, #tpu.memory_space<vmem>>, vector<1x4x256xf32>
    %cst = arith.constant dense<0.000000e+00> : vector<1x4xf32>
    %1 = vector.multi_reduction <add>, %0, %cst [2] : vector<1x4x256xf32> to vector<1x4xf32>
    %2 = vector.shape_cast %1 : vector<1x4xf32> to vector<1x4x1xf32>
    %3 = arith.mulf %0, %0 : vector<1x4x256xf32>
    %cst_2 = arith.constant dense<0.000000e+00> : vector<1x4xf32>
    %4 = vector.multi_reduction <add>, %3, %cst_2 [2] : vector<1x4x256xf32> to vector<1x4xf32>
    %5 = vector.shape_cast %4 : vector<1x4xf32> to vector<1x4x1xf32>
    %cst_3 = arith.constant 3.906250e-03 : f32
    %6 = vector.broadcast %cst_3 : f32 to vector<1x4x1xf32>
    %7 = arith.mulf %2, %6 : vector<1x4x1xf32>
    %cst_4 = arith.constant 2.560000e+02 : f32
    %8 = vector.broadcast %cst_4 : f32 to vector<1x4x1xf32>
    %9 = arith.mulf %8, %7 : vector<1x4x1xf32>
    %10 = arith.mulf %9, %7 : vector<1x4x1xf32>
    %11 = arith.subf %5, %10 : vector<1x4x1xf32>
    %cst_5 = arith.constant 0.00392156886 : f32
    %12 = vector.broadcast %cst_5 : f32 to vector<1x4x1xf32>
    %13 = arith.mulf %11, %12 : vector<1x4x1xf32>
    %cst_6 = arith.constant dense<0.000000e+00> : vector<1x1xf32>
    %14 = vector.multi_reduction <add>, %2, %cst_6 [1] : vector<1x4x1xf32> to vector<1x1xf32>
    %15 = vector.shape_cast %14 : vector<1x1xf32> to vector<1x1x1xf32>
    %cst_7 = arith.constant 9.765625E-4 : f32
    %16 = vector.broadcast %cst_7 : f32 to vector<1x1x1xf32>
    %17 = arith.mulf %15, %16 : vector<1x1x1xf32>
    %cst_8 = arith.constant dense<0.000000e+00> : vector<1x1xf32>
    %18 = vector.multi_reduction <add>, %5, %cst_8 [1] : vector<1x4x1xf32> to vector<1x1xf32>
    %19 = vector.shape_cast %18 : vector<1x1xf32> to vector<1x1x1xf32>
    %cst_9 = arith.constant 1.024000e+03 : f32
    %20 = vector.broadcast %cst_9 : f32 to vector<1x1x1xf32>
    %21 = arith.mulf %20, %17 : vector<1x1x1xf32>
    %22 = arith.mulf %21, %17 : vector<1x1x1xf32>
    %23 = arith.subf %19, %22 : vector<1x1x1xf32>
    %cst_10 = arith.constant 9.77517105E-4 : f32
    %24 = vector.broadcast %cst_10 : f32 to vector<1x1x1xf32>
    %25 = arith.mulf %23, %24 : vector<1x1x1xf32>
    %cst_11 = arith.constant 9.99999974E-6 : f32
    %26 = vector.broadcast %cst_11 : f32 to vector<1x4x1xf32>
    %27 = arith.addf %13, %26 : vector<1x4x1xf32>
    %28 = math.rsqrt %27 : vector<1x4x1xf32>
    %cst_12 = arith.constant 9.99999974E-6 : f32
    %29 = vector.broadcast %cst_12 : f32 to vector<1x1x1xf32>
    %30 = arith.addf %25, %29 : vector<1x1x1xf32>
    %31 = math.rsqrt %30 : vector<1x1x1xf32>
    %c0_13 = arith.constant 0 : index
    %c0_14 = arith.constant 0 : index
    %c0_15 = arith.constant 0 : index
    %32 = vector.load %arg2[%c0_13, %c0_14, %c0_15] : memref<1x4x1xf32, #tpu.memory_space<vmem>>, vector<1x4x1xf32>
    %c0_16 = arith.constant 0 : index
    %c0_17 = arith.constant 0 : index
    %c0_18 = arith.constant 0 : index
    %33 = vector.load %arg3[%c0_16, %c0_17, %c0_18] : memref<1x4x1xf32, #tpu.memory_space<vmem>>, vector<1x4x1xf32>
    %cst_19 = arith.constant 1.000000e+00 : f32
    %34 = vector.broadcast %cst_19 : f32 to vector<1x4x1xf32>
    %35 = arith.subf %34, %32 : vector<1x4x1xf32>
    %36 = arith.mulf %32, %28 : vector<1x4x1xf32>
    %37 = vector.broadcast %31 : vector<1x1x1xf32> to vector<1x4x1xf32>
    %38 = arith.mulf %35, %37 : vector<1x4x1xf32>
    %39 = arith.addf %36, %38 : vector<1x4x1xf32>
    %40 = arith.mulf %7, %28 : vector<1x4x1xf32>
    %41 = arith.mulf %32, %40 : vector<1x4x1xf32>
    %42 = arith.mulf %17, %31 : vector<1x1x1xf32>
    %43 = vector.broadcast %42 : vector<1x1x1xf32> to vector<1x4x1xf32>
    %44 = arith.mulf %35, %43 : vector<1x4x1xf32>
    %45 = arith.addf %41, %44 : vector<1x4x1xf32>
    %46 = arith.mulf %33, %39 : vector<1x4x1xf32>
    %47 = arith.mulf %33, %45 : vector<1x4x1xf32>
    %48 = arith.subf %33, %47 : vector<1x4x1xf32>
    %49 = vector.broadcast %46 : vector<1x4x1xf32> to vector<1x4x256xf32>
    %50 = arith.mulf %0, %49 : vector<1x4x256xf32>
    %51 = vector.broadcast %48 : vector<1x4x1xf32> to vector<1x4x256xf32>
    %52 = arith.addf %50, %51 : vector<1x4x256xf32>
    %c0_20 = arith.constant 0 : index
    %c0_21 = arith.constant 0 : index
    %c0_22 = arith.constant 0 : index
    %53 = vector.load %arg4[%c0_20, %c0_21, %c0_22] : memref<1x4x256xf32, #tpu.memory_space<vmem>>, vector<1x4x256xf32>
    tpu.vector_store %arg4[%c0_20, %c0_21, %c0_22], %52 {strides = array<i32>} : memref<1x4x256xf32, #tpu.memory_space<vmem>>, vector<1x4x256xf32>,
    return
  }
  func.func @transform_0(%arg0: i32) -> (i32, i32, i32) {
    %c0_i32 = arith.constant 0 : i32
    %c0_i32_0 = arith.constant 0 : i32
    %c0_i32_1 = arith.constant 0 : i32
    return %arg0, %c0_i32, %c0_i32_0 : i32, i32, i32
  }
  func.func @transform_1(%arg0: i32) -> (i32, i32, i32) {
    %c0_i32 = arith.constant 0 : i32
    %c0_i32_0 = arith.constant 0 : i32
    %c0_i32_1 = arith.constant 0 : i32
    %c0_i32_2 = arith.constant 0 : i32
    return %c0_i32, %c0_i32_0, %c0_i32_1 : i32, i32, i32
  }
  func.func @transform_2(%arg0: i32) -> (i32, i32, i32) {
    %c0_i32 = arith.constant 0 : i32
    %c0_i32_0 = arith.constant 0 : i32
    %c0_i32_1 = arith.constant 0 : i32
    %c0_i32_2 = arith.constant 0 : i32
    return %c0_i32, %c0_i32_0, %c0_i32_1 : i32, i32, i32
  }
  func.func @transform_3(%arg0: i32) -> (i32, i32, i32) {
    %c0_i32 = arith.constant 0 : i32
    %c0_i32_0 = arith.constant 0 : i32
    %c0_i32_1 = arith.constant 0 : i32
    return %arg0, %c0_i32, %c0_i32_0 : i32, i32, i32
  }
}

</mosaic_0001>

<bundles_post_ra>
// kernel: tpu_custom_call.1
= control target key start
LH: loop header
LB: loop body
LE: loop exit
PB: predicated region body
PF: predicated region fallthrough
CT: control target
= control target key end

     0   :  { %8 = vsyncpa [#allocation3], 0  ;;  %s721_s0 = inlined_call_operand.hbm [shape: f32[2,4,256], index: 0, kind: input, shape index: {}]   ;;  %s722_s1 = inlined_call_operand.vmem [shape: f32[1,4,1], index: 1, kind: input, shape index: {}]   ;;  %s723_s2 = inlined_call_operand.vmem [shape: f32[1,4,1], index: 2, kind: input, shape index: {}]   ;;  %s724_s3 = inlined_call_operand.hbm [shape: f32[2,4,256], index: 3, kind: output, shape index: {}]  }
   0x1   :  { %10 = vsyncpa [#allocation3 + $0x1], 0 }
   0x2   :  { %11 = vsyncpa [#allocation4], 0 }
   0x3   :  { %13 = vsyncpa [#allocation4 + $0x1], 0  ;;  %s572_s12 = smov 0   ;;  %s574_s13 = smov 0  }
   0x4   :  { %s576_s14 = smov 0   ;;  %s578_s15 = smov 0  }
   0x5 LB: > { %s593_s16 = sadd.s32 4294967295, %s548_s15   ;;  %s382_s17 = sadd.s32 4294967294, %s548_s15   ;;  %s548_s15 = sphi %s578_s15, %s734_s15   ;;  %s544_s14 = sphi %s576_s14, %s733_s14   ;;  %s540_s13 = sphi %s574_s13, %s732_s13   ;;  %s536_s12 = sphi %s572_s12, %s731_s12  }
   0x6   : > { %s597_s18 = sadd.s32 1, %s548_s15   ;;  %s26_s19 = sadd.s32 1, %s544_s14 }
   0x7   : > { %s23_s20 = ssub.s32 %s548_s15, %s597_s18  ;;  %p33_p0 = scmp.ne.s32.totalorder %s544_s14, %s540_s13 }
   0x8   : > { %p24_p1 = scmp.eq.s32.totalorder %s23_s20, 0  ;;  %p34_p2 = scmp.eq.s32.totalorder %s548_s15, 0 }
   0x9   : > { %p39_p3 = scmp.ne.s32.totalorder %s540_s13, %s536_s12  ;;  %p40_p4 = scmp.eq.s32.totalorder %s593_s16, 0 }
   0xa   : > { %s609_s21 = scalar_select %p24_p1, %s544_s14, %s26_s19  }
   0xb   : > { %p611_p5 = por %p34_p2, %p33_p0  ;;  %p615_p6 = por %p40_p4, %p39_p3 }
   0xc   : > { %p105_p7 = scmp.eq.s32.totalorder %s593_s16, 1  ;;  %p111_p8 = scmp.eq.s32.totalorder %s382_s17, 1 }
   0xd   : > { %p410_p10 = scmp.lt.s32.totalorder %s548_s15, 2  ;;  %s137_s26 = sand.u32 1, %s544_s14  }
   0xe   : > { %p622_p11 = por %p105_p7, %p33_p0  ;;  %p626_p12 = por %p111_p8, %p39_p3 }
   0xf   : > { %s396_s27 = sshll.u32 %s548_s15, 3  ;;  %s385_s28 = sshll.u32 %s137_s26, 3 }
  0x10   : > { %s146_s4 = scalar_lea.hbm %s721_s0, %s396_s27  ;;  %s141_s6 = scalar_lea.vmem [#allocation2], %s385_s28 }
  0x11   : > { %s148_s5 = sshll.u32 %s146_s4, 4  ;;  %s150_s7 = sshll.u32 %s141_s6, 4  ;;  %s149_s5 = int_to_ptr.hbm [resolvable:$true] %s148_s5  ;;  %s151_s7 = int_to_ptr.vmem [resolvable:$true] %s150_s7 }
  0x12   : > { %p637_p13 = pnand %p410_p10, %p611_p5  ;;  %p388_p0 = scmp.ge.s32.totalorder %s548_s15, 1 }
  0x13   : > { %p155_p1 = scmp.lt.s32.totalorder %s548_s15, 3  ;;  %s138_s9 = scalar_lea.sflag [#allocation3], %s137_s26 }
  0x14   : > { %s452_s10 = sshra.s32 %s149_s5, 4  ;;  %p456_p3 = pneg %p637_p13  ;;  %s453_s10 = int_to_ptr.hbm [resolvable:$true] %s452_s10 }
  0x15   : > { %s454_s11 = scalar_lea.hbm %s453_s10, 8  ;;  %s459_s20 = scalar_lea.hbm %s721_s0, 16 }
  0x16   : > { %p455_p2 = scmp.ne.s32.totalorder %s453_s10, %s454_s11  ;;  %p460_p5 = scmp.lt.s32.totalorder %s453_s10, %s721_s0 }
  0x17   : > { %p461_p8 = scmp.lt.s32.totalorder %s459_s20, %s454_s11 }
  0x18   : > { %p457_p4 = pnand %p456_p3, %p455_p2 }
  0x19   : > { %p462_p10 = por %p461_p8, %p460_p5 }
  0x1a   : > { %p458_p7 = pneg %p457_p4 }
  0x1c   : > { %p463_p9 = pnand %p462_p10, %p458_p7 }
  0x1e   : > { %466 = shalt.err (!%p463_p9)
}
  0x1f   : > { %405 = dma.hbm_to_vmem [thread:$0]  (!%p637_p13), %s149_s5, 128, %s151_s7, %s138_s9  }
  0x20   : > { %p156_p2 = pnand %p388_p0, %p155_p1 }
  0x21   : > { %s658_s26 = sand.u32 (!%p156_p2), 1, %s540_s13  }
  0x22   : > { %159 = sbr.rel (%p156_p2) target bundleno = 349 (0x15d), region = 32  ;;  %s389_s28 = sshll.u32 (!%p156_p2), %s658_s26, 3 }
  0x23   : > { %s162_s29 = scalar_lea.sflag (!%p156_p2), [#allocation3], %s658_s26  ;;  %s165_s30 = scalar_lea.vmem (!%p156_p2), [#allocation2], %s389_s28 }
  0x27   : > { %527 = dma.done.wait (%p615_p6), %s162_s29, 128  }
  0x28   : > { %529 = vsyncadd (%p615_p6), %s162_s29, 4294967168  ;;  %v668_v0 = vld [vmem:[%s165_s30] sm:$0xff]  ;;  %vm196_vm0 = vcmask 1043456   ;;  %v550_v18 = vmov 0   ;;  %v260_v53 = vld [vmem:[%s722_s1] sm:$0xf] }
  0x29   : > { %191 = vst [vmem:[#allocation1] ss:$2 sm:$0xff] %v668_v0  ;;  %v202_v1 = vmul.f32 %v668_v0, %v668_v0  ;;  %446 = vset.pattern.permute.xlu1 %v550_v18  ;;  %447 = vset.pattern.permute.xlu0 %v550_v18  ;;  %v262_v54 = vsub.f32 1.0, %v260_v53  ;;  %v261_v61 = vld [vmem:[%s723_s2] sm:$0xf]  ;;  %s397_s7 = sshll.u32 %s593_s16, 3 }
  0x2a   : > { %s307_s10 = scalar_lea.hbm %s724_s3, %s397_s7  ;;  %s188_s11 = scalar_lea.vmem [#allocation5], %s389_s28 }
  0x2b   : > { %s309_s17 = sshll.u32 %s188_s11, 4  ;;  %s311_s19 = sshll.u32 %s307_s10, 4  ;;  %s310_s17 = int_to_ptr.vmem [resolvable:$true] %s309_s17  ;;  %s312_s19 = int_to_ptr.hbm [resolvable:$true] %s311_s19 }
  0x2c   : > { %s296_s20 = scalar_lea.sflag [#allocation4], %s658_s26  ;;  %s496_s16 = sshra.s32 %s312_s19, 4  ;;  %s497_s16 = int_to_ptr.hbm [resolvable:$true] %s496_s16 }
  0x2d   : > { %s498_s22 = scalar_lea.hbm %s497_s16, 8  ;;  %s502_s28 = scalar_lea.hbm %s724_s3, 16 }
  0x2e   : > { %p499_p6 = scmp.ne.s32.totalorder %s497_s16, %s498_s22  ;;  %p503_p0 = scmp.lt.s32.totalorder %s497_s16, %s724_s3 }
  0x2f   : > { %p504_p1 = scmp.lt.s32.totalorder %s502_s28, %s498_s22 }
  0x30   : > { %v192_v2 = vld.sshfl [vmem:[#allocation1] sm:$0xff pattern:$0x75316420]  ;;  %v193_v3 = vld.sshfl [vmem:[#allocation1 + $0x8] sm:$0xff pattern:$0x75316420]  ;;  %p500_p9 = pnand %p499_p6, %p622_p11 }
  0x31   : > { %v197_v4 = vsel %vm196_vm0, %v192_v2, 0.0  ;;  %v198_v5 = vsel %vm196_vm0, %v193_v3, 0.0  ;;  %204 = vst [vmem:[#allocation1] ss:$2 sm:$0xff] %v202_v1  ;;  %p505_p3 = por %p504_p1, %p503_p0 }
  0x32   : > { %v199_v6 = vadd.f32 %v198_v5, %v197_v4  ;;  %p501_p13 = pneg %p500_p9 }
  0x34   : > { %200 = vadd.xlane.f32.xlu0 %v199_v6  ;;  %v551_v6 = vmov 839922192   ;;  %p506_p4 = pnand %p505_p3, %p501_p13 }
  0x38   : > { %v205_v7 = vld.sshfl [vmem:[#allocation1] sm:$0xff pattern:$0x75316420]  ;;  %v206_v8 = vld.sshfl [vmem:[#allocation1 + $0x8] sm:$0xff pattern:$0x75316420] }
  0x39   : > { %v209_v9 = vsel %vm196_vm0, %v205_v7, 0.0  ;;  %v210_v10 = vsel %vm196_vm0, %v206_v8, 0.0  ;;  %v279_v7 = vunpack.c.l.s4 %v551_v6 }
  0x3a   : > { %v211_v11 = vadd.f32 %v210_v10, %v209_v9 }
  0x3b   : > { %v280_v9 = vunpack.c.0.s8 %v279_v7 }
  0x3c   : > { %212 = vadd.xlane.f32.xlu0 %v211_v11 }
  0xa7   : > { %v201_v12 = vpop.xlane.xlu0 %200 }
  0xa8   : > { %v214_v13 = vmul.f32 0.00390625, %v201_v12  ;;  %v219_v14 = vsel %vm196_vm0, %v201_v12, 0.0 }
  0xa9   : > { %v220_v15 = vrot.slane %v219_v14, 4 }
  0xaa   : > { %v215_v16 = vmul.f32 256.0, %v214_v13 }
  0xab   : > { %v221_v17 = vadd.f32 %v220_v15, %v219_v14 }
  0xac   : > { %v216_v20 = vmul.f32 %v215_v16, %v214_v13 }
  0xad   : > { %v222_v19 = vrot.slane %v221_v17, 2 }
  0xaf   : > { %v223_v21 = vadd.f32 %v222_v19, %v221_v17  ;;  %v213_v22 = vpop.xlane.xlu0 %212 }
  0xb0   : > { %v217_v23 = vsub.f32 %v213_v22, %v216_v20  ;;  %v227_v24 = vsel %vm196_vm0, %v213_v22, 0.0 }
  0xb1   : > { %v224_v25 = vrot.slane %v223_v21, 1  ;;  %v228_v26 = vrot.slane %v227_v24, 4 }
  0xb2   : > { %v218_v27 = vmul.f32 0.003921569, %v217_v23 }
  0xb3   : > { %v225_v28 = vadd.f32 %v224_v25, %v223_v21  ;;  %v229_v29 = vadd.f32 %v228_v26, %v227_v24 }
  0xb4   : > { %v238_v30 = vadd.f32 1e-05, %v218_v27 }
  0xb5   : > { %v226_v31 = vmul.f32 0.0009765625, %v225_v28  ;;  %v230_v32 = vrot.slane %v229_v29, 2 }
  0xb6   : > { %448 = vrsqrt.f32 %v238_v30  ;;  %vm245_vm2 = vweird.f32 %v238_v30 }
  0xb7   : > { %v234_v33 = vmul.f32 1024.0, %v226_v31  ;;  %v231_v34 = vadd.f32 %v230_v32, %v229_v29 }
  0xb9   : > { %v232_v35 = vrot.slane %v231_v34, 1  ;;  %v235_v36 = vmul.f32 %v234_v33, %v226_v31 }
  0xbb   : > { %v233_v37 = vadd.f32 %v232_v35, %v231_v34 }
  0xbc   : > { %v449_v38 = vpop.eup %448 }
  0xbd   : > { %v236_v39 = vsub.f32 %v233_v37, %v235_v36  ;;  %v240_v40 = vmul.f32 %v449_v38, %v238_v30  ;;  %vm246_vm1 = vweird.f32 %v449_v38 }
  0xbe   : > { %vm247_vm3 = vmor %vm245_vm2, %vm246_vm1 }
  0xbf   : > { %v237_v41 = vmul.f32 0.0009775171, %v236_v39  ;;  %v241_v42 = vmul.f32 %v449_v38, %v240_v40 }
  0xc1   : > { %v249_v43 = vadd.f32 1e-05, %v237_v41  ;;  %v242_v44 = vmul.f32 0.5, %v241_v42 }
  0xc3   : > { %450 = vrsqrt.f32 %v249_v43  ;;  %v243_v45 = vsub.f32 1.5, %v242_v44  ;;  %vm256_vm5 = vweird.f32 %v249_v43 }
  0xc5   : > { %v244_v48 = vmul.f32 %v449_v38, %v243_v45 }
  0xc7   : > { %v248_v51 = vsel %vm247_vm3, %v449_v38, %v244_v48 }
  0xc8   : > { %v266_v56 = vmul.f32 %v248_v51, %v214_v13  ;;  %v263_v58 = vmul.f32 %v260_v53, %v248_v51 }
  0xc9   : > { %v451_v46 = vpop.eup %450 }
  0xca   : > { %v251_v47 = vmul.f32 %v451_v46, %v249_v43  ;;  %vm257_vm4 = vweird.f32 %v451_v46  ;;  %v267_v63 = vmul.f32 %v266_v56, %v260_v53 }
  0xcb   : > { %vm258_vm6 = vmor %vm256_vm5, %vm257_vm4 }
  0xcc   : > { %v252_v49 = vmul.f32 %v451_v46, %v251_v47 }
  0xce   : > { %v253_v50 = vmul.f32 0.5, %v252_v49 }
  0xd0   : > { %v254_v52 = vsub.f32 1.5, %v253_v50 }
  0xd2   : > { %v255_v55 = vmul.f32 %v451_v46, %v254_v52 }
  0xd4   : > { %v259_v57 = vsel %vm258_vm6, %v451_v46, %v255_v55 }
  0xd5   : > { %v264_v59 = vmul.f32 %v262_v54, %v259_v57  ;;  %v268_v60 = vmul.f32 %v259_v57, %v226_v31 }
  0xd7   : > { %v265_v62 = vadd.f32 %v264_v59, %v263_v58  ;;  %v269_v1 = vmul.f32 %v268_v60, %v262_v54 }
  0xd9   : > { %v271_v2 = vmul.f32 %v265_v62, %v261_v61  ;;  %v270_v3 = vadd.f32 %v269_v1, %v267_v63 }
  0xdb   : > { %276 = vperm.xlu1 %446, %v271_v2   ;;  %v272_v4 = vmul.f32 %v270_v3, %v261_v61 }
  0xdd   : > { %v273_v5 = vsub.f32 %v261_v61, %v272_v4 }
  0xe3   : > { %286 = vperm.xlu1 %446, %v273_v5  }
 0x14d   : > { %v277_v8 = vpop.permute.xlu1 %276 }
 0x14e   : > { %v281_v10 = vperm.slane %v277_v8, %v280_v9 }
 0x150   : > { %v283_v12 = vmul.f32 %v281_v10, %v668_v0 }
 0x155   : > { %v287_v11 = vpop.permute.xlu1 %286 }
 0x156   : > { %v291_v13 = vperm.slane %v287_v11, %v280_v9 }
 0x158   : > { %v293_v14 = vadd.f32 %v291_v13, %v283_v12 }
 0x15a   : > { %294 = vst [vmem:[%s188_s11] sm:$0xff] %v293_v14 }
 0x15b   : > { %509 = shalt.err (!%p506_p4)
}
 0x15c   : > { %400 = dma.vmem_to_hbm [thread:$0]  (%p622_p11), %s310_s17, 128, %s312_s19, %s296_s20  }
 0x15d PF: > { %s323_s26 = sand.u32 1, %s536_s12   ;;  %p730_p7 = scmp.ge.s32.totalorder %s548_s15, 2 }
 0x15e   : > { %s324_s4 = scalar_lea.sflag [#allocation4], %s323_s26 }
 0x15f   : > { %p407_p5 = pnand %p730_p7, %p626_p12 }
 0x161   : > { %p408_p8 = pneg %p407_p5 }
 0x163   : > { %531 = dma.done.wait (%p408_p8), %s324_s4, 128  }
 0x164   : > { %533 = vsyncadd (%p408_p8), %s324_s4, 4294967168  ;;  %p16_p10 = scmp.ge.s32.totalorder %s597_s18, 4   ;;  %s731_s12 = smov %s540_s13 }
 0x165   : > { %s732_s13 = smov %s544_s14  ;;  %s733_s14 = smov %s609_s21 }
 0x166   : > { %s734_s15 = smov %s597_s18  ;;  %18 = sbr.rel (!%p16_p10) target bundleno = 5 (0x5), region = 77 }
 0x16b   :  { %330 = vsyncpa [#allocation3], 1 }
 0x16c   :  { %332 = vsyncpa [#allocation3 + $0x1], 1 }
 0x16d   :  { %333 = vsyncpa [#allocation4], 1 }
 0x16e   :  { %335 = vsyncpa [#allocation4 + $0x1], 1 }

</bundles_post_ra>
